<compile_context>
chip_gen: v5e
topology: v5e:2x2
jax: 0.10.0
libtpu: 0.0.40
codegen_flags: <defaults>
</compile_context>

<pallas_src>
import numpy as np
import jax
import jax.numpy as jnp
from jax.experimental import pallas as pl
from jax.experimental.pallas import tpu as pltpu

IMAGENET_MEAN = (0.485, 0.456, 0.406)
IMAGENET_STD = (0.229, 0.224, 0.225)


# ---------------------------------------------------------------------------
# Roll-semantics probe (verify pltpu.roll shift sign on real hardware).
# ---------------------------------------------------------------------------

def detect_roll_matches_jnp():
    """True iff pltpu.roll(x, s)[..., i] == x[..., (i - s) % N] (jnp.roll)."""
    def k(x_ref, o_ref):
        o_ref[...] = pltpu.roll(x_ref[...], 1, axis=1)
    x = jnp.arange(128, dtype=jnp.float32).reshape(1, 128)
    y = pl.pallas_call(k, out_shape=jax.ShapeDtypeStruct((1, 128), jnp.float32))(x)
    return float(y[0, 0]) == 127.0


def _shift_amount(d, hw, roll_like_jnp):
    """Static roll amount that brings flat pixel (p + d) to position p."""
    return (-d) % hw if roll_like_jnp else d % hw


# ---------------------------------------------------------------------------
# In-kernel building blocks (traced inside the fused Pallas kernels).
# ---------------------------------------------------------------------------

def _tap_masks(H, W):
    """9 (1, H*W) f32 validity masks computed in-kernel from iota (no DMA)."""
    HW = H * W
    pos = jax.lax.broadcasted_iota(jnp.int32, (1, HW), 1)
    row = pos // W
    col = pos - row * W
    masks = []
    for dy in (-1, 0, 1):
        for dx in (-1, 0, 1):
            ok = ((row + dy >= 0) & (row + dy < H) &
                  (col + dx >= 0) & (col + dx < W))
            masks.append(ok.astype(jnp.float32))
    return masks


def _conv3x3_relu(x, w_ref, b_ref, masks, W, roll_like_jnp):
    """3x3 conv (stride 1, zero pad 1) + bias + ReLU on (Cin, H*W) features.

    ONE MXU matmul: the 9 shifted/masked taps are stacked on the sublane axis
    (9*Cin, HW) and contracted against pre-stacked bf16 weights (Cout, 9*Cin).
    Shifts are XLU lane rolls; masks zero the row/column wrap-around (zero
    padding).  Stacking/masking runs on VPU/XLU in f32; the dot uses bf16
    operands with f32 accumulation.
    """
    Cin, HW = x.shape
    pieces = []
    for dy in (-1, 0, 1):
        for dx in (-1, 0, 1):
            tap = (dy + 1) * 3 + (dx + 1)
            d = dy * W + dx
            if d == 0:
                pieces.append(x)                           # center tap, no mask
            else:
                shift = _shift_amount(d, HW, roll_like_jnp)
                pieces.append(pltpu.roll(x, shift, axis=1) * masks[tap])
    stack = jnp.concatenate(pieces, axis=0).astype(jnp.bfloat16)   # (9*Cin, HW)
    acc = jnp.dot(w_ref[...], stack, preferred_element_type=jnp.float32)
    return jnp.maximum(acc + b_ref[...], 0.0)


def _features(img, nsc_ref, nbi_ref, masks, w1_ref, b1_ref, w2_ref, b2_ref,
              W, roll_like_jnp):
    """VGG-ish perceptual net: ImageNet normalize + 2 x (3x3 conv + ReLU)."""
    x = img * nsc_ref[...] + nbi_ref[...]                  # (Cin, HW) f32
    f1 = _conv3x3_relu(x, w1_ref, b1_ref, masks, W, roll_like_jnp)
    f2 = _conv3x3_relu(f1, w2_ref, b2_ref, masks, W, roll_like_jnp)
    return f1, f2


def _gram(f):
    """Gram matrix of channel-major features (C, HW): (F F^T) / (C*HW).

    Contracts the lane axis directly on the MXU (bf16 operands, f32 acc)."""
    C, HW = f.shape
    fb = f.astype(jnp.bfloat16)
    g = jax.lax.dot_general(fb, fb, (((1,), (1,)), ((), ())),
                            preferred_element_type=jnp.float32)
    return g * (1.0 / float(C * HW))


def _mse(a, b):
    """F.mse_loss(a, b, reduction='mean'), kept as a (1, 1) array."""
    d = a - b
    return jnp.sum(d * d, keepdims=True) * (1.0 / float(d.size))


# ---------------------------------------------------------------------------
# Fused per-step forward kernel (the hot path: one launch per iteration).
# ---------------------------------------------------------------------------

def make_loss_fn(H, W, cin, style_ratio, second_scale_ratio, roll_like_jnp):
    HW = H * W
    Hh, Wh = H // 2, W // 2
    sr = float(style_ratio)
    ssr = float(second_scale_ratio)

    def kernel(canvas_ref, nsc_ref, nbi_ref, pool_ref,
               w1_ref, b1_ref, w2_ref, b2_ref,
               g1f_ref, g2f_ref, cf_ref, g1h_ref, g2h_ref, ch_ref,
               img_ref, loss_ref):
        # canvas(): ParameterizedImg -> sigmoid of the pixel parameters.
        img = jax.nn.sigmoid(canvas_ref[...])               # (cin, HW) f32
        # TODO(synk): drop / decimate this writeback once logging cadence and
        # the fused optimizer loop exist (it is only used for visualization).
        img_ref[...] = img

        # ---- NeuralStyleLoss at full scale --------------------------------
        masks_f = _tap_masks(H, W)
        f1, f2 = _features(img, nsc_ref, nbi_ref, masks_f,
                           w1_ref, b1_ref, w2_ref, b2_ref, W, roll_like_jnp)
        style_f = _mse(_gram(f1), g1f_ref[...]) + _mse(_gram(f2), g2f_ref[...])
        content_f = _mse(f2, cf_ref[...])
        loss_f = (1.0 - sr) * content_f + sr * style_f

        # ---- half scale: bilinear(0.5, align_corners=False) == 2x2 average,
        #      one bf16 MXU matmul with the pooling matrix (kept in VMEM).
        img_h = jnp.dot(img.astype(jnp.bfloat16), pool_ref[...],
                        preferred_element_type=jnp.float32)  # (cin, HW/4) f32
        masks_h = _tap_masks(Hh, Wh)
        f1h, f2h = _features(img_h, nsc_ref, nbi_ref, masks_h,
                             w1_ref, b1_ref, w2_ref, b2_ref, Wh, roll_like_jnp)
        style_h = _mse(_gram(f1h), g1h_ref[...]) + _mse(_gram(f2h), g2h_ref[...])
        content_h = _mse(f2h, ch_ref[...])
        loss_h = (1.0 - sr) * content_h + sr * style_h

        total = loss_f + ssr * loss_h                        # what gets backproped

        # Pack the 7 scalars into one lane-dense (1, 128) unmasked store.
        lane = jax.lax.broadcasted_iota(jnp.int32, (1, 128), 1)
        vec = jnp.zeros((1, 128), jnp.float32)
        for idx, v in enumerate((loss_f, content_f, style_f,
                                 loss_h, content_h, style_h, total)):
            vec = vec + jnp.where(lane == idx, v, 0.0)
        loss_ref[...] = vec

    # No grid: everything fits trivially in VMEM at this size, so a single
    # whole-array invocation is both simplest and fastest.
    return jax.jit(pl.pallas_call(
        kernel,
        out_shape=(jax.ShapeDtypeStruct((cin, HW), jnp.float32),    # img
                   jax.ShapeDtypeStruct((1, 128), jnp.float32)),    # loss vec
    ))


# ---------------------------------------------------------------------------
# Fused target kernel: set_style + set_content for one scale (setup, runs once)
# ---------------------------------------------------------------------------

def make_targets_fn(H, W, C1, C2, roll_like_jnp):
    HW = H * W

    def kernel(style_ref, content_ref, nsc_ref, nbi_ref,
               w1_ref, b1_ref, w2_ref, b2_ref,
               g1_ref, g2_ref, cf_ref):
        masks = _tap_masks(H, W)
        sf1, sf2 = _features(style_ref[...], nsc_ref, nbi_ref, masks,
                             w1_ref, b1_ref, w2_ref, b2_ref, W, roll_like_jnp)
        g1_ref[...] = _gram(sf1)                  # style Gram @ relu1
        g2_ref[...] = _gram(sf2)                  # style Gram @ relu2
        _, cf2 = _features(content_ref[...], nsc_ref, nbi_ref, masks,
                           w1_ref, b1_ref, w2_ref, b2_ref, W, roll_like_jnp)
        cf_ref[...] = cf2                         # content features @ relu2

    return jax.jit(pl.pallas_call(
        kernel,
        out_shape=(jax.ShapeDtypeStruct((C1, C1), jnp.float32),
                   jax.ShapeDtypeStruct((C2, C2), jnp.float32),
                   jax.ShapeDtypeStruct((C2, HW), jnp.float32)),
    ))


# ---------------------------------------------------------------------------
# Host-side (one-time) constant preparation.
# ---------------------------------------------------------------------------

def make_pool_matrix(H, W):
    """(H*W, (H/2)*(W/2)) matrix P: img_flat @ P == bilinear 0.5 downsample
    (align_corners=False, even H/W) == 2x2 average pooling."""
    Hh, Wh = H // 2, W // 2
    p = jnp.arange(H * W)
    q = (p // W // 2) * Wh + (p % W) // 2
    return 0.25 * (q[:, None] == jnp.arange(Hh * Wh)[None, :]).astype(jnp.float32)


def pack_conv(w, b, cin_pad=None):
    """torch conv weights (Cout, Cin, 3, 3) -> tap-stacked bf16 (Cout, 9*Cin_pad)
    (column tap*Cin_pad + ci <-> w[:, ci, tap//3, tap%3]) and (Cout, 1) f32 bias."""
    cout, cin = w.shape[0], w.shape[1]
    cin_pad = cin if cin_pad is None else cin_pad
    wt = jnp.transpose(w, (0, 2, 3, 1))                   # (Cout, 3, 3, Cin)
    if cin_pad > cin:
        wt = jnp.pad(wt, ((0, 0), (0, 0), (0, 0), (0, cin_pad - cin)))
    w_flat = wt.reshape(cout, 9 * cin_pad).astype(jnp.bfloat16)
    return w_flat, b.reshape(cout, 1)


def neural_style_forward(loss_fn, canvas_flat, consts, targets_full, targets_half, hw):
    """One iteration of the recipe's forward(_) closure (forward math only)."""
    H, W = hw
    img_flat, lv = loss_fn(canvas_flat, *consts, *targets_full, *targets_half)
    img = img_flat[:3].reshape(3, H, W)
    # The recipe returns the *second-scale* loss/losses (loss is reassigned)
    # plus the full-resolution image; `total` is what would be backproped.
    return {"loss": lv[0, 3], "content": lv[0, 4], "style": lv[0, 5],
            "img": img, "total": lv[0, 6],
            "loss_full": lv[0, 0], "content_full": lv[0, 1], "style_full": lv[0, 2]}


# ---------------------------------------------------------------------------
# Pure-JAX (host) reference of the same forward, mirroring the kernel's bf16
# matmul-operand rounding so a tight tolerance check is meaningful.
# ---------------------------------------------------------------------------

def _ref_round_bf16(x):
    return x.astype(jnp.bfloat16).astype(jnp.float32)


def _avgpool2(x):
    C, H, W = x.shape
    return x.reshape(C, H // 2, 2, W // 2, 2).mean(axis=(2, 4))


def _ref_conv3x3_relu(x, w, b):
    C, H, W = x.shape
    xb = _ref_round_bf16(x)
    wb = _ref_round_bf16(w)
    xp = jnp.pad(xb, ((0, 0), (1, 1), (1, 1)))
    out = jnp.zeros((w.shape[0], H, W), jnp.float32)
    for ky in range(3):
        for kx in range(3):
            out = out + jnp.einsum("oi,ihw->ohw", wb[:, :, ky, kx],
                                   xp[:, ky:ky + H, kx:kx + W],
                                   preferred_element_type=jnp.float32)
    return jnp.maximum(out + b[:, None, None], 0.0)


def _ref_features(img, w1, b1, w2, b2):
    nsc = (1.0 / jnp.array(IMAGENET_STD, jnp.float32)).reshape(3, 1, 1)
    nbi = (-jnp.array(IMAGENET_MEAN, jnp.float32)
           / jnp.array(IMAGENET_STD, jnp.float32)).reshape(3, 1, 1)
    x = img * nsc + nbi
    f1 = _ref_conv3x3_relu(x, w1, b1)
    f2 = _ref_conv3x3_relu(f1, w2, b2)
    return f1, f2


def _ref_gram(f):
    C = f.shape[0]
    ff = _ref_round_bf16(f.reshape(C, -1))
    return (ff @ ff.T) * (1.0 / float(ff.size))


def _ref_mse(a, b):
    d = a - b
    return jnp.sum(d * d) / d.size


def _ref_scale_loss(img, style_img, content_img, w1, b1, w2, b2, sr):
    f1, f2 = _ref_features(img, w1, b1, w2, b2)
    s1, s2 = _ref_features(style_img, w1, b1, w2, b2)
    _, c2 = _ref_features(content_img, w1, b1, w2, b2)
    style = (_ref_mse(_ref_gram(f1), _ref_gram(s1)) +
             _ref_mse(_ref_gram(f2), _ref_gram(s2)))
    content = _ref_mse(f2, c2)
    loss = (1.0 - sr) * content + sr * style
    return loss, content, style


# ---------------------------------------------------------------------------

if __name__ == "__main__":
    key = jax.random.PRNGKey(0)
    kc, ks, kp, kw1, kb1, kw2, kb2 = jax.random.split(key, 7)

    H = W = 32                       # HW=1024, HW/4=256: both lane-dense (x128)
    Hh, Wh = H // 2, W // 2
    HW = H * W
    C1, C2 = 8, 16
    CIN = 8                          # image channels padded 3 -> 8 (sublane-aligned taps)
    style_ratio = 0.7
    second_scale_ratio = 1.0

    # NCHW with N=1 at the PyTorch interface; internally CHW flattened to (CIN, H*W).
    content_img = jax.random.uniform(kc, (3, H, W), jnp.float32)
    style_img = jax.random.uniform(ks, (3, H, W), jnp.float32)
    canvas_param = 0.1 * jax.random.normal(kp, (3, H, W), jnp.float32)

    # Deterministic "VGG-ish" conv weights in torch layout (real VGG weights
    # are a checkpoint; structure matches NeuralStyleLoss's perceptual net).
    w1_t = 0.2 * jax.random.normal(kw1, (C1, 3, 3, 3), jnp.float32)
    b1 = 0.01 * jax.random.normal(kb1, (C1,), jnp.float32)
    w2_t = 0.2 * jax.random.normal(kw2, (C2, C1, 3, 3), jnp.float32)
    b2 = 0.01 * jax.random.normal(kb2, (C2,), jnp.float32)
    w1_flat, b1_col = pack_conv(w1_t, b1, cin_pad=CIN)
    w2_flat, b2_col = pack_conv(w2_t, b2)

    mean = jnp.array(IMAGENET_MEAN, jnp.float32).reshape(3, 1)
    std = jnp.array(IMAGENET_STD, jnp.float32).reshape(3, 1)
    norm_scale = jnp.zeros((CIN, 1), jnp.float32).at[:3].set(1.0 / std)
    norm_bias = jnp.zeros((CIN, 1), jnp.float32).at[:3].set(-mean / std)

    pool_bf16 = make_pool_matrix(H, W).astype(jnp.bfloat16)     # (HW, HW/4)

    def to_flat_padded(img3):
        flat = img3.reshape(img3.shape[0], -1)
        return jnp.pad(flat, ((0, CIN - img3.shape[0]), (0, 0)))

    canvas_flat = to_flat_padded(canvas_param)
    content_flat = to_flat_padded(content_img)
    style_flat = to_flat_padded(style_img)

    # fit(): targets are built from f32 bilinear-0.5 (== 2x2 average) images.
    content_half_img = _avgpool2(content_img)
    style_half_img = _avgpool2(style_img)
    content_half_flat = to_flat_padded(content_half_img)
    style_half_flat = to_flat_padded(style_half_img)

    # Verify pltpu.roll shift-sign semantics on hardware and adapt.
    roll_like_jnp = detect_roll_matches_jnp()

    consts = (norm_scale, norm_bias, pool_bf16, w1_flat, b1_col, w2_flat, b2_col)
    tgt_args = (norm_scale, norm_bias, w1_flat, b1_col, w2_flat, b2_col)

    # set_style / set_content at both scales (setup path, runs once).
    targets_full = make_targets_fn(H, W, C1, C2, roll_like_jnp)(
        style_flat, content_flat, *tgt_args)
    targets_half = make_targets_fn(Hh, Wh, C1, C2, roll_like_jnp)(
        style_half_flat, content_half_flat, *tgt_args)

    # One training-step forward == ONE fused Pallas kernel launch.
    loss_fn = make_loss_fn(H, W, CIN, style_ratio, second_scale_ratio, roll_like_jnp)
    out = neural_style_forward(loss_fn, canvas_flat, consts,
                               targets_full, targets_half, (H, W))
    jax.block_until_ready(out)

    # ---- host-side reference check (review correctness concerns) ----------
    img_full = jax.nn.sigmoid(canvas_param)
    lf, cf_, sf_ = _ref_scale_loss(img_full, style_img, content_img,
                                   w1_t, b1, w2_t, b2, style_ratio)
    img_half = _avgpool2(_ref_round_bf16(img_full))   # mirror bf16 pooling operand
    lh, ch_, sh_ = _ref_scale_loss(img_half, style_half_img, content_half_img,
                                   w1_t, b1, w2_t, b2, style_ratio)
    tot = lf + second_scale_ratio * lh

    got = np.array([float(out["loss_full"]), float(out["content_full"]),
                    float(out["style_full"]), float(out["loss"]),
                    float(out["content"]), float(out["style"]),
                    float(out["total"])], dtype=np.float64)
    want = np.array([float(lf), float(cf_), float(sf_), float(lh),
                     float(ch_), float(sh_), float(tot)], dtype=np.float64)
    np.testing.assert_allclose(got, want, rtol=2e-2, atol=1e-5)
    assert out["img"].shape == (3, H, W)

    print("KERNEL_OK")
</pallas_src>

<mosaic_0001>
module attributes {stable_mosaic.version = 11 : i64} {
  func.func @k(%arg0: memref<1x128xf32, #tpu.memory_space<vmem>>, %arg1: memref<1x128xf32, #tpu.memory_space<vmem>>) attributes {dimension_semantics = [], scalar_prefetch = 0 : i64, scratch_operands = 0 : i64, tpu.core_type = #tpu.core_type<tc>} {
    %c0 = arith.constant 0 : index
    %c0_0 = arith.constant 0 : index
    %0 = vector.load %arg0[%c0, %c0_0] : memref<1x128xf32, #tpu.memory_space<vmem>>, vector<1x128xf32>
    %c1_i32 = arith.constant 1 : i32
    %1 = tpu.dynamic_rotate %0 by %c1_i32 dim 1 : vector<1x128xf32>, i32 -> vector<1x128xf32>
    %c0_1 = arith.constant 0 : index
    %c0_2 = arith.constant 0 : index
    %2 = vector.load %arg1[%c0_1, %c0_2] : memref<1x128xf32, #tpu.memory_space<vmem>>, vector<1x128xf32>
    tpu.vector_store %arg1[%c0_1, %c0_2], %1 {strides = array<i32>} : memref<1x128xf32, #tpu.memory_space<vmem>>, vector<1x128xf32>,
    return
  }
}

</mosaic_0001>

<bundles_post_ra>
// kernel: tpu_custom_call.1
= control target key start
LH: loop header
LB: loop body
LE: loop exit
PB: predicated region body
PF: predicated region fallthrough
CT: control target
= control target key end

     0   :  { %6 = vsyncpa [#allocation3], 0  ;;  %s118_s0 = inlined_call_operand.hbm [shape: f32[1,128], index: 0, kind: input, shape index: {}]   ;;  %s119_s1 = inlined_call_operand.hbm [shape: f32[1,128], index: 1, kind: output, shape index: {}]  }
   0x1   :  { %7 = vsyncpa [#allocation4], 0  ;;  %s13_s8 = sshll.u32 %s118_s0, 4  ;;  %s99_s9 = smov [#allocation2]   ;;  %s14_s8 = int_to_ptr.hbm [resolvable:$true] %s13_s8 }
   0x2   :  { %s15_s10 = sshll.u32 %s99_s9, 4  ;;  %s16_s10 = int_to_ptr.vmem [resolvable:$true] %s15_s10 }
   0x3   :  { %18 = dma.hbm_to_vmem [thread:$0]  %s14_s8, 16, %s16_s10, [#allocation3]  }
   0x4   :  { %95 = dma.done.wait [#allocation3], 16  }
   0x5   :  { %96 = vsyncadd [#allocation3], 4294967280  ;;  %v23_v0 = vld [vmem:[#allocation2] sm:$0x1]  ;;  %s100_s11 = smov 1   ;;  %s101_s12 = smov [#allocation5]  }
   0x6   :  { %24 = vrot.lane.b32.xlu0 %v23_v0, %s100_s11  ;;  %s32_s13 = sshll.u32 %s101_s12, 4  ;;  %s34_s16 = sshll.u32 %s119_s1, 4  ;;  %s33_s13 = int_to_ptr.vmem [resolvable:$true] %s32_s13  ;;  %s35_s16 = int_to_ptr.hbm [resolvable:$true] %s34_s16 }
  0x78   :  { %v25_v1 = vpop.permute.xlu0 %24 }
  0x79   :  { %26 = vst [vmem:[#allocation5] sm:$0x1] %v25_v1 }
  0x7a   :  { %37 = dma.vmem_to_hbm [thread:$0]  %s33_s13, 16, %s35_s16, [#allocation4]  }
  0x7b   :  { %97 = dma.done.wait [#allocation4], 16  }
  0x7c   :  { %98 = vsyncadd [#allocation4], 4294967280 }
  0x7d   :  { %42 = vsyncpa [#allocation3], 1 }
  0x7e   :  { %43 = vsyncpa [#allocation4], 1 }

</bundles_post_ra>
